<compile_context>
chip_gen: v6e
topology: v6e:2x2x1
jax: 0.10.0
libtpu: 0.0.40
codegen_flags: <defaults>
</compile_context>

<pallas_src>
import functools

import numpy as np
import jax
import jax.numpy as jnp
from jax import lax
from jax.experimental import pallas as pl
from jax.experimental.pallas import tpu as pltpu


# ----------------------------------------------------------------------------
# pltpu.roll direction probe (pins the shift convention across JAX versions)
# ----------------------------------------------------------------------------
@functools.lru_cache(maxsize=None)
def _roll_matches_jnp_roll():
    """True iff pltpu.roll follows jnp.roll semantics: result[i] = x[(i - shift) % n]."""

    def probe(x_ref, o_ref):
        o_ref[...] = pltpu.roll(x_ref[...], shift=1, axis=0)

    x = jnp.arange(8 * 128, dtype=jnp.int32).reshape(8, 128)
    y = pl.pallas_call(probe, out_shape=jax.ShapeDtypeStruct((8, 128), jnp.int32))(x)
    return bool(np.asarray(y)[1, 0] == 0)


# ----------------------------------------------------------------------------
# weight / bias packing (done once, outside the kernel)
# ----------------------------------------------------------------------------
def _pack_weight(w):
    """(3, 3, Cin, Cout) taps -> (4*Cin, 4*Cout) bf16.

    K blocks (rows): operand order [x, x(+col), x(+row), x(+row,+col)].
    N blocks (cols): output parity order [ee, eo, oe, oo]  (dy, dx).
    Scatter rule: out[2r+dy, 2c+dx] += x[i, j] * w[ki, kj] with 2i+ki-1 = 2r+dy,
    2j+kj-1 = 2c+dx.
    """
    cin, cout = w.shape[2], w.shape[3]
    wp = jnp.zeros((4, cin, 4, cout), jnp.float32)
    wp = wp.at[0, :, 0].set(w[1, 1])          # ee
    wp = wp.at[0, :, 1].set(w[1, 2])          # eo
    wp = wp.at[1, :, 1].set(w[1, 0])
    wp = wp.at[0, :, 2].set(w[2, 1])          # oe
    wp = wp.at[2, :, 2].set(w[0, 1])
    wp = wp.at[0, :, 3].set(w[2, 2])          # oo
    wp = wp.at[1, :, 3].set(w[2, 0])
    wp = wp.at[2, :, 3].set(w[0, 2])
    wp = wp.at[3, :, 3].set(w[0, 0])
    return wp.reshape(4 * cin, 4 * cout).astype(jnp.bfloat16)


def _pack_bias(b):
    return jnp.tile(b.astype(jnp.float32).reshape(1, -1), (1, 4))   # (1, 4*Cout)


# ----------------------------------------------------------------------------
# Pallas kernel: packed 2x transposed conv (k=3, s=2, p=1, op=1) [+ fused residual]
# ----------------------------------------------------------------------------
def _convt_kernel(x_ref, w_ref, b_ref, *rest, ws, m0, two_cout, has_base, roll_forward):
    # x_ref    : (M, Cin)              M = S * Hs * Ws rows, row index = (slice, r, c)
    # w_ref    : (4*Cin, 4*Cout)       packed taps, bf16 (resident)
    # b_ref    : (1, 4*Cout)           bias tiled over the 4 parities, f32 (resident)
    # base_ref : (S*Hs, 2, Ws, 2*Cout) optional residual (natural-layout view)
    # out_ref  : (S*Hs, 2, Ws, 2*Cout) output (natural-layout view)
    if has_base:
        base_ref, out_ref = rest
    else:
        (out_ref,) = rest

    x = x_ref[...].astype(jnp.float32)                         # (M, Cin)
    m = x.shape[0]

    # Boundary masks over the flattened (slice, r, c) row index.
    pos = lax.broadcasted_iota(jnp.int32, (m, 1), 0)
    interior_col = (pos % ws) < (ws - 1)                       # c != Ws - 1
    interior_row = (pos % m0) < (m0 - ws)                      # r != Hs - 1

    def shift_up(v, k):
        # result[p] = v[p + k]; wrapped rows only land on masked positions.
        amt = (m - k) if roll_forward else k
        return pltpu.roll(v, shift=amt, axis=0)

    zero = jnp.zeros_like(x)
    x_c = jnp.where(interior_col, shift_up(x, 1), zero)                        # x[r, c+1]
    x_r = jnp.where(interior_row, shift_up(x, ws), zero)                       # x[r+1, c]
    x_rc = jnp.where(interior_col & interior_row, shift_up(x, ws + 1), zero)   # x[r+1, c+1]

    # Single packed MXU matmul: K = 4*Cin, N = 4*Cout (parities ee|eo|oe|oo), f32 acc.
    xp = jnp.concatenate([x, x_c, x_r, x_rc], axis=-1).astype(jnp.bfloat16)
    res = jnp.dot(xp, w_ref[...], preferred_element_type=jnp.float32)          # (M, 4*Cout)
    res = res + b_ref[...]

    n_rows = m // ws                                           # = S * Hs
    even = res[:, :two_cout].reshape(n_rows, ws, two_cout)     # output rows 2r
    odd = res[:, two_cout:].reshape(n_rows, ws, two_cout)      # output rows 2r + 1
    if has_base:
        even = even + base_ref[:, 0, :, :].astype(jnp.float32)
        odd = odd + base_ref[:, 1, :, :].astype(jnp.float32)
    out_ref[:, 0, :, :] = even.astype(out_ref.dtype)
    out_ref[:, 1, :, :] = odd.astype(out_ref.dtype)


def _choose_slices_per_block(bt, m0):
    """Whole (b, t) slices per grid step.

    Blocks must cover whole slices (the roll + mask construction assumes it).  Aim for
    >= 256 rows per block (amortize ~0.35us/step and give the MXU a real M), cap rows so
    double-buffered blocks stay small in VMEM, and prefer >= 2 grid steps so the grid can
    split across TensorCores (v7x megacore); a no-op on single-TC v5e/v6e.
    """
    divisors = [s for s in range(1, bt + 1) if bt % s == 0]
    valid = [s for s in divisors if (s * m0) % 8 == 0 or s == bt]
    good = [s for s in valid if s * m0 <= 2048] or [min(valid)]
    s = max(good)
    if s == bt and bt > 1:
        smaller = [t for t in valid if t < bt and t * m0 >= 256]
        if smaller:
            s = max(smaller)
    return s


def _convt_up_2x(x_small, base_full, w_packed, b_packed, *, out_dtype):
    """One 2x upsampling step:  ConvTranspose2x(x_small) [+ base_full], channels-last."""
    B, T, Hs, Ws, Cin = x_small.shape
    cout4 = w_packed.shape[1]
    Cout = cout4 // 4
    BT = B * T
    M0 = Hs * Ws
    H, W = 2 * Hs, 2 * Ws

    S = _choose_slices_per_block(BT, M0)
    grid = (BT // S,)
    has_base = base_full is not None
    roll_forward = _roll_matches_jnp_roll()

    # Free row-major re-views (no data movement in HBM).
    x_flat = x_small.reshape(BT * M0, Cin)
    args = [x_flat, w_packed, b_packed]
    in_specs = [
        pl.BlockSpec((S * M0, Cin), lambda i: (i, 0)),
        pl.BlockSpec((4 * Cin, 4 * Cout), lambda i: (0, 0)),
        pl.BlockSpec((1, 4 * Cout), lambda i: (0, 0)),
    ]
    if has_base:
        base_view = base_full.astype(jnp.float32).reshape(BT * Hs, 2, Ws, 2 * Cout)
        args.append(base_view)
        in_specs.append(pl.BlockSpec((S * Hs, 2, Ws, 2 * Cout), lambda i: (i, 0, 0, 0)))

    kernel = functools.partial(
        _convt_kernel, ws=Ws, m0=M0, two_cout=2 * Cout,
        has_base=has_base, roll_forward=roll_forward)

    out_view = pl.pallas_call(
        kernel,
        out_shape=jax.ShapeDtypeStruct((BT * Hs, 2, Ws, 2 * Cout), out_dtype),
        grid=grid,
        in_specs=in_specs,
        out_specs=pl.BlockSpec((S * Hs, 2, Ws, 2 * Cout), lambda i: (i, 0, 0, 0)),
        compiler_params=pltpu.CompilerParams(
            dimension_semantics=("parallel",),
            vmem_limit_bytes=32 * 1024 * 1024,
        ),
    )(*args)

    return out_view.reshape(B, T, H, W, Cout)        # free re-view back to NTHWC


# ----------------------------------------------------------------------------
# FusionBlock3d wrapper (afno_fusion=False)
# ----------------------------------------------------------------------------
class FusionBlock3dPallas:
    def __init__(self, dim, size_ratios, dim_out=None, *, key):
        n = len(size_ratios)
        if not isinstance(dim, (tuple, list)):
            dim = (dim,) * n
        if dim_out is None:
            dim_out = dim[0]
        self.dim = tuple(dim)
        self.dim_out = dim_out
        self.size_ratios = tuple(size_ratios)
        self.raw_params = []      # per source: [(w (3,3,Cin,Cout) f32, b (Cout,) f32), ...]
        self.packed_params = []   # per source: [(w_packed bf16, b_packed f32), ...]
        for i, sr in enumerate(size_ratios):
            raw_steps, packed_steps = [], []
            r = sr
            while r > 1:
                cin = self.dim[i]
                cout = dim_out if r == 2 else self.dim[i]
                key, kw, kb = jax.random.split(key, 3)
                # NOTE: torch's ConvTranspose default init uses fan_in = Cout*kH*kW; the
                # init choice is irrelevant to the kernel math checked here.
                bound = 1.0 / np.sqrt(cin * 9)
                w = jax.random.uniform(kw, (3, 3, cin, cout), jnp.float32, -bound, bound)
                b = jax.random.uniform(kb, (cout,), jnp.float32, -bound, bound)
                raw_steps.append((w, b))
                packed_steps.append((_pack_weight(w), _pack_bias(b)))
                r //= 2
            self.raw_params.append(raw_steps)
            self.packed_params.append(packed_steps)

    def __call__(self, xs):
        # ratio == 1 sources: plain adds (they become the fused residual base below).
        acc = None
        for i, sr in enumerate(self.size_ratios):
            if sr == 1:
                xi = xs[i].astype(jnp.float32)
                acc = xi if acc is None else acc + xi
        # ratio > 1 sources: chain of 2x steps; the final step fuses "+ acc" in-kernel.
        for i, sr in enumerate(self.size_ratios):
            if sr == 1:
                continue
            cur = xs[i]
            steps = self.packed_params[i]
            for s, (wp, bp) in enumerate(steps):
                last = s == len(steps) - 1
                cur = _convt_up_2x(
                    cur,
                    acc if last else None,                       # residual only on last step
                    wp, bp,
                    out_dtype=jnp.float32 if last else jnp.bfloat16,
                )
            acc = cur
        return acc


# ----------------------------------------------------------------------------
# Pure-jnp (XLA) reference, mirroring the kernel's bf16-input / f32-accumulate policy
# ----------------------------------------------------------------------------
def _ref_convt_step(x, w, b):
    xq = x.astype(jnp.bfloat16).astype(jnp.float32)
    wq = w.astype(jnp.bfloat16).astype(jnp.float32)
    B, T, Hs, Ws, _ = x.shape
    Cout = w.shape[-1]
    out = jnp.zeros((B, T, 2 * Hs, 2 * Ws, Cout), jnp.float32)
    for ki in range(3):
        r0 = 1 if ki == 0 else 0
        y0 = 2 * r0 + ki - 1
        nr = Hs - r0
        for kj in range(3):
            c0 = 1 if kj == 0 else 0
            x0 = 2 * c0 + kj - 1
            nc = Ws - c0
            contrib = jnp.einsum("bthwc,co->bthwo", xq[:, :, r0:, c0:, :], wq[ki, kj])
            out = out.at[:, :, y0:y0 + 2 * nr:2, x0:x0 + 2 * nc:2, :].add(contrib)
    return out + b.astype(jnp.float32)


def _ref_forward(xs, raw_params, size_ratios):
    acc = None
    for i, _ in enumerate(size_ratios):
        y = xs[i].astype(jnp.float32)
        steps = raw_params[i]
        for s, (w, b) in enumerate(steps):
            y = _ref_convt_step(y, w, b)
            if s != len(steps) - 1:
                y = y.astype(jnp.bfloat16).astype(jnp.float32)   # kernel stores bf16 intermediates
        acc = y if acc is None else acc + y
    return acc


# ----------------------------------------------------------------------------
if __name__ == "__main__":
    key = jax.random.PRNGKey(0)
    kp, k0, k1, k2 = jax.random.split(key, 4)

    dim = (8, 4, 4)
    size_ratios = (1, 2, 4)
    B, T = 2, 4
    H = W = 16

    block = FusionBlock3dPallas(dim, size_ratios, dim_out=None, key=kp)

    xs = [
        jax.random.normal(k0, (B, T, H, W, dim[0]), jnp.float32),            # ratio 1 (identity)
        jax.random.normal(k1, (B, T, H // 2, W // 2, dim[1]), jnp.float32),  # ratio 2
        jax.random.normal(k2, (B, T, H // 4, W // 4, dim[2]), jnp.float32),  # ratio 4
    ]

    out = jax.block_until_ready(block(xs))
    assert out.shape == (B, T, H, W, dim[0]), out.shape

    ref = _ref_forward(xs, block.raw_params, size_ratios)
    np.testing.assert_allclose(np.asarray(out), np.asarray(ref), rtol=5e-3, atol=5e-3)

    print("KERNEL_OK")
</pallas_src>

<mosaic_0001>
module attributes {stable_mosaic.version = 11 : i64} {
  func.func @probe(%arg0: memref<8x128xi32, #tpu.memory_space<vmem>>, %arg1: memref<8x128xi32, #tpu.memory_space<vmem>>) attributes {dimension_semantics = [], scalar_prefetch = 0 : i64, scratch_operands = 0 : i64, tpu.core_type = #tpu.core_type<tc>} {
    %c0 = arith.constant 0 : index
    %c0_0 = arith.constant 0 : index
    %0 = vector.load %arg0[%c0, %c0_0] : memref<8x128xi32, #tpu.memory_space<vmem>>, vector<8x128xi32>
    %c1_i32 = arith.constant 1 : i32
    %1 = tpu.dynamic_rotate %0 by %c1_i32 dim 0 : vector<8x128xi32>, i32 -> vector<8x128xi32>
    %c0_1 = arith.constant 0 : index
    %c0_2 = arith.constant 0 : index
    %2 = vector.load %arg1[%c0_1, %c0_2] : memref<8x128xi32, #tpu.memory_space<vmem>>, vector<8x128xi32>
    tpu.vector_store %arg1[%c0_1, %c0_2], %1 {strides = array<i32>} : memref<8x128xi32, #tpu.memory_space<vmem>>, vector<8x128xi32>,
    return
  }
}

</mosaic_0001>

<bundles_post_ra>
// kernel: tpu_custom_call.1
= control target key start
LH: loop header
LB: loop body
LE: loop exit
PB: predicated region body
PF: predicated region fallthrough
CT: control target
= control target key end

     0   :  { %6 = vsyncpa [#allocation3], 0  ;;  %s103_s0 = inlined_call_operand.hbm [shape: s32[8,128], index: 0, kind: input, shape index: {}]   ;;  %s104_s1 = inlined_call_operand.hbm [shape: s32[8,128], index: 1, kind: output, shape index: {}]  }
   0x1   :  { %7 = vsyncpa [#allocation4], 0  ;;  %s85_s6 = smov [#allocation2]  }
   0x2   :  { %s14_s7 = sshll.u32 %s85_s6, 4  ;;  %s15_s7 = int_to_ptr.vmem [resolvable:$true] %s14_s7 }
   0x3   :  { %s49_s8 = scalar_lea.vmem %s15_s7, 128  ;;  %p54_p1 = scmp.lt.s32.totalorder %s15_s7, %s15_s7 }
   0x4   :  { %p50_p0 = scmp.ne.s32.totalorder %s15_s7, %s49_s8  ;;  %p55_p2 = scmp.lt.s32.totalorder %s49_s8, %s49_s8 }
   0x6   :  { %p56_p3 = por %p55_p2, %p54_p1 }
   0x8   :  { %p57_p4 = pnand %p56_p3, %p50_p0 }
   0xa   :  { %60 = shalt.err (!%p57_p4)
}
   0xb   :  { %17 = dma.hbm_to_vmem [thread:$0]  %s103_s0, 128, %s15_s7, [#allocation3]  }
   0xc   :  { %81 = dma.done.wait [#allocation3], 128  }
   0xd   :  { %82 = vsyncadd [#allocation3], 4294967168  ;;  %s86_s11 = smov [#allocation5]   ;;  %v21_v0 = vld [vmem:[#allocation2] sm:$0xff] }
   0xe   :  { %s30_s12 = sshll.u32 %s86_s11, 4  ;;  %v22_v1 = vrot.slane %v21_v0, 7  ;;  %s31_s12 = int_to_ptr.vmem [resolvable:$true] %s30_s12 }
   0xf   :  { %s61_s13 = scalar_lea.vmem %s31_s12, 128  ;;  %p66_p6 = scmp.lt.s32.totalorder %s31_s12, %s31_s12 }
  0x10   :  { %23 = vst [vmem:[#allocation5] sm:$0xff] %v22_v1  ;;  %p62_p5 = scmp.ne.s32.totalorder %s31_s12, %s61_s13  ;;  %p67_p7 = scmp.lt.s32.totalorder %s61_s13, %s61_s13 }
  0x12   :  { %p68_p8 = por %p67_p7, %p66_p6 }
  0x14   :  { %p69_p9 = pnand %p68_p8, %p62_p5 }
  0x16   :  { %72 = shalt.err (!%p69_p9)
}
  0x17   :  { %33 = dma.vmem_to_hbm [thread:$0]  %s31_s12, 128, %s104_s1, [#allocation4]  }
  0x18   :  { %83 = dma.done.wait [#allocation4], 128  }
  0x19   :  { %84 = vsyncadd [#allocation4], 4294967168 }
  0x1a   :  { %37 = vsyncpa [#allocation3], 1 }
  0x1b   :  { %38 = vsyncpa [#allocation4], 1 }

</bundles_post_ra>
